<compile_context>
chip_gen: v7x
topology: tpu7x:2x2x1
jax: 0.10.0
libtpu: 0.0.40
codegen_flags: <defaults>
</compile_context>

<pallas_src>
import functools

import jax
import jax.numpy as jnp
from jax import lax
from jax.experimental import pallas as pl
from jax.experimental.pallas import tpu as pltpu

_EPS = 1e-8  # PyTorch nn.CosineSimilarity default eps
_EPS2 = _EPS * _EPS
_VMEM_LIMIT = 32 * 1024 * 1024  # safe on v5e/v6e (128 MiB phys) and v7x (64 MiB phys)


# ---------------------------------------------------------------------------
# Helpers
# ---------------------------------------------------------------------------
def _cdiv(a, b):
    return -(-a // b)


def _round_up(a, b):
    return ((a + b - 1) // b) * b


def _pick_row_tile(n_rows, n_cols, itemsize, target_bytes=2 << 20):
    """Row tile for HBM-bound row kernels: ~target_bytes of VMEM per tile.

    Uses the lane-padded width (VMEM stores >=128 lanes per row group) so small-H
    inputs still get large row tiles without blowing the VMEM budget."""
    eff_cols = _round_up(max(1, n_cols), 128)
    rows = max(8, (target_bytes // (eff_cols * itemsize)) // 8 * 8)
    if n_rows <= rows:
        return n_rows          # single full-extent block (always a legal sublane extent)
    return rows                # multiple of 8; ragged edge handled as a partial block


def _pick_mxu_tile(dim, mult, max_tile=256):
    """MXU tile: full dim if small, else <=256 rounded to `mult`, minimizing edge waste."""
    if dim <= max_tile:
        return dim
    nblk = _cdiv(dim, max_tile)
    return _round_up(_cdiv(dim, nblk), mult)


# ---------------------------------------------------------------------------
# Kernels
# ---------------------------------------------------------------------------
def _inv_norm_kernel(x_ref, o_ref, *, scale):
    """x:(TR,H) -> o:(TR,1) = scale / max(||x_r||, eps)  (f32 sums, EUP rsqrt)."""
    x = x_ref[...].astype(jnp.float32)
    ss = jnp.sum(x * x, axis=-1, keepdims=True)
    o_ref[...] = (scale * lax.rsqrt(jnp.maximum(ss, _EPS2))).astype(o_ref.dtype)


def _cos_pairwise_fused_kernel(x_ref, y_ref, o_ref, *, inv_temp):
    """Single-K-step pairwise cosine: norms fused, no scratch.

    y rows are normalized in VMEM (same-layout (TN,1) broadcast), the matmul then
    produces x·ŷ, and the x-side scale 1/(||x||*temp) is applied row-wise to the
    output — this avoids any sublane->lane relayout of the y-norm vector."""
    x = x_ref[...]
    yf = y_ref[...].astype(jnp.float32)
    yinv = lax.rsqrt(jnp.maximum(jnp.sum(yf * yf, axis=-1, keepdims=True), _EPS2))
    y_n = (yf * yinv).astype(x.dtype)

    dot = lax.dot_general(x, y_n,
                          dimension_numbers=(((1,), (1,)), ((), ())),
                          preferred_element_type=jnp.float32)          # (TM, TN)

    xf = x.astype(jnp.float32)
    xinv = lax.rsqrt(jnp.maximum(jnp.sum(xf * xf, axis=-1, keepdims=True), _EPS2))
    o_ref[...] = (dot * (xinv * inv_temp)).astype(o_ref.dtype)


def _cos_pairwise_ktiled_kernel(x_ref, y_ref, xinv_ref, yinv_ref, o_ref, acc_ref):
    """K-tiled x:(TM,TK) @ y:(TN,TK)^T, f32 accumulator, hoisted inv-norm scales."""
    k = pl.program_id(2)

    @pl.when(k == 0)
    def _():
        acc_ref[...] = jnp.zeros_like(acc_ref)

    acc_ref[...] += lax.dot_general(
        x_ref[...], y_ref[...],
        dimension_numbers=(((1,), (1,)), ((), ())),
        preferred_element_type=jnp.float32)

    @pl.when(k == pl.num_programs(2) - 1)
    def _():
        # xinv:(TM,1) already carries 1/temp; yinv:(1,TN).
        o_ref[...] = (acc_ref[...] * xinv_ref[...] * yinv_ref[...]).astype(o_ref.dtype)


def _cos_rowwise_kernel(x_ref, y_ref, o_ref, *, inv_temp):
    """x,y:(TR,H) -> o:(TR,1) = cos(x_r, y_r) / temp (lane reduction, EUP rsqrt)."""
    x = x_ref[...].astype(jnp.float32)
    y = y_ref[...].astype(jnp.float32)
    dot = jnp.sum(x * y, axis=-1, keepdims=True)
    xinv = lax.rsqrt(jnp.maximum(jnp.sum(x * x, axis=-1, keepdims=True), _EPS2))
    yinv = lax.rsqrt(jnp.maximum(jnp.sum(y * y, axis=-1, keepdims=True), _EPS2))
    o_ref[...] = (dot * xinv * yinv * inv_temp).astype(o_ref.dtype)


def _dot_kernel(x_ref, y_ref, o_ref, acc_ref, *, tr, steps_per_core, rows_valid):
    """Streamed flat dot: per-step pure VPU multiply-add into an (8,128) f32 accumulator.

    Grid is (2, steps): the leading "parallel" axis splits row-blocks across the two
    v7x TensorCores (harmless serial loop elsewhere).  Out-of-range rows (ragged edge
    and the clamped duplicate block of the idle core) are masked by row index."""
    c = pl.program_id(0)
    i = pl.program_id(1)

    @pl.when(i == 0)
    def _():
        acc_ref[...] = jnp.zeros_like(acc_ref)

    row0 = (c * steps_per_core + i) * tr
    rid = row0 + lax.broadcasted_iota(jnp.int32, (tr, 128), 0)
    prod = jnp.where(rid < rows_valid,
                     x_ref[...].astype(jnp.float32) * y_ref[...].astype(jnp.float32),
                     0.0)
    # (TR,128) -> (TR//8, 8, 128) sum over the leading axis is plain vreg adds (no XLU).
    acc_ref[...] += jnp.sum(prod.reshape(tr // 8, 8, 128), axis=0)

    @pl.when(i == steps_per_core - 1)
    def _():
        o_ref[0] = acc_ref[...]


# ---------------------------------------------------------------------------
# pallas_call wrappers
# ---------------------------------------------------------------------------
def _call_inv_norm(x2d, scale):
    R, H = x2d.shape
    TR = _pick_row_tile(R, H, jnp.dtype(x2d.dtype).itemsize)
    return pl.pallas_call(
        functools.partial(_inv_norm_kernel, scale=float(scale)),
        out_shape=jax.ShapeDtypeStruct((R, 1), jnp.float32),
        grid=(_cdiv(R, TR),),
        in_specs=[pl.BlockSpec((TR, H), lambda i: (i, 0))],
        out_specs=pl.BlockSpec((TR, 1), lambda i: (i, 0)),
        compiler_params=pltpu.CompilerParams(
            dimension_semantics=("parallel",),
            vmem_limit_bytes=_VMEM_LIMIT),
    )(x2d)


def _call_cos_pairwise(x2d, y2d, temp, out_dtype):
    M, H = x2d.shape
    N, _ = y2d.shape
    dt = jnp.result_type(x2d.dtype, y2d.dtype)
    x2d = x2d.astype(dt)
    y2d = y2d.astype(dt)
    itemsize = jnp.dtype(dt).itemsize

    sub = max(8, 32 // itemsize)        # dtype-native sublane multiple (8 f32 / 16 bf16 / 32 i8)
    TM = _pick_mxu_tile(M, sub)         # full dim if M<=256, else <=256 multiple of `sub`
    TN = _pick_mxu_tile(N, 128)         # full dim if N<=256, else 256 (lane-dense output)
    inv_temp = 1.0 / float(temp)

    if H * itemsize <= 8192:
        # Single resident K step (f32 H<=2048 / bf16 H<=4096): fused norms, no pad, no scratch.
        # TODO(synk): optional bf16 operand cast for f32 inputs (3x MXU) left out to keep numerics exact.
        return pl.pallas_call(
            functools.partial(_cos_pairwise_fused_kernel, inv_temp=inv_temp),
            out_shape=jax.ShapeDtypeStruct((M, N), out_dtype),
            grid=(_cdiv(M, TM), _cdiv(N, TN)),
            in_specs=[pl.BlockSpec((TM, H), lambda i, j: (i, 0)),
                      pl.BlockSpec((TN, H), lambda i, j: (j, 0))],
            out_specs=pl.BlockSpec((TM, TN), lambda i, j: (i, j)),
            compiler_params=pltpu.CompilerParams(
                dimension_semantics=("parallel", "parallel"),
                vmem_limit_bytes=_VMEM_LIMIT),
        )(x2d, y2d)

    # Large-H path: K-tiled with f32 accumulator.  Zero-pad only the contraction dim
    # (required for correctness of partial K blocks); hoisted inv-norms read x/y once.
    TK = 1024
    Hp = _round_up(H, TK)
    xinv = _call_inv_norm(x2d, scale=inv_temp)              # (M,1) f32, 1/temp folded in
    yinv = _call_inv_norm(y2d, scale=1.0).reshape(1, N)     # (1,N) f32
    xp = jnp.pad(x2d, ((0, 0), (0, Hp - H)))
    yp = jnp.pad(y2d, ((0, 0), (0, Hp - H)))
    return pl.pallas_call(
        _cos_pairwise_ktiled_kernel,
        out_shape=jax.ShapeDtypeStruct((M, N), out_dtype),
        grid=(_cdiv(M, TM), _cdiv(N, TN), Hp // TK),
        in_specs=[
            pl.BlockSpec((TM, TK), lambda i, j, k: (i, k)),
            pl.BlockSpec((TN, TK), lambda i, j, k: (j, k)),
            pl.BlockSpec((TM, 1), lambda i, j, k: (i, 0)),
            pl.BlockSpec((1, TN), lambda i, j, k: (0, j)),
        ],
        out_specs=pl.BlockSpec((TM, TN), lambda i, j, k: (i, j)),
        scratch_shapes=[pltpu.VMEM((TM, TN), jnp.float32)],
        compiler_params=pltpu.CompilerParams(
            dimension_semantics=("parallel", "parallel", "arbitrary"),
            vmem_limit_bytes=_VMEM_LIMIT),
    )(xp, yp, xinv, yinv)


def _call_cos_rowwise(x2d, y2d, temp, out_dtype):
    R, H = x2d.shape
    dt = jnp.result_type(x2d.dtype, y2d.dtype)
    x2d = x2d.astype(dt)
    y2d = y2d.astype(dt)
    TR = _pick_row_tile(R, H, jnp.dtype(dt).itemsize)
    out = pl.pallas_call(
        functools.partial(_cos_rowwise_kernel, inv_temp=1.0 / float(temp)),
        out_shape=jax.ShapeDtypeStruct((R, 1), out_dtype),
        grid=(_cdiv(R, TR),),
        in_specs=[pl.BlockSpec((TR, H), lambda i: (i, 0)),
                  pl.BlockSpec((TR, H), lambda i: (i, 0))],
        out_specs=pl.BlockSpec((TR, 1), lambda i: (i, 0)),
        compiler_params=pltpu.CompilerParams(
            dimension_semantics=("parallel",),
            vmem_limit_bytes=_VMEM_LIMIT),
    )(x2d, y2d)
    return out[:, 0]


def _call_dot(xflat, yflat, out_dtype, max_rows=2048):
    dt = jnp.result_type(xflat.dtype, yflat.dtype)
    xflat = xflat.astype(dt)
    yflat = yflat.astype(dt)
    L = int(xflat.shape[0])
    LANES = 128

    rows_p = _round_up(max(1, _cdiv(L, LANES)), 8)   # sublane-aligned row count
    Lp = rows_p * LANES
    if Lp != L:                                       # only pad for reshape alignment
        xflat = jnp.pad(xflat, (0, Lp - L))
        yflat = jnp.pad(yflat, (0, Lp - L))
    x2 = xflat.reshape(rows_p, LANES)
    y2 = yflat.reshape(rows_p, LANES)

    TR = min(max_rows, rows_p)                        # 2048 rows * 128 lanes ~= 1 MiB f32 / step
    nblk = _cdiv(rows_p, TR)
    steps = _cdiv(nblk, 2)                            # half the row-blocks per core

    def in_map(c, i):
        # Clamp the (possibly out-of-range) logical block of the second core; the
        # kernel's row mask zeroes its contribution.
        return (jnp.minimum(c * steps + i, nblk - 1), 0)

    partials = pl.pallas_call(
        functools.partial(_dot_kernel, tr=TR, steps_per_core=steps, rows_valid=rows_p),
        out_shape=jax.ShapeDtypeStruct((2, 8, LANES), jnp.float32),
        grid=(2, steps),
        in_specs=[pl.BlockSpec((TR, LANES), in_map),
                  pl.BlockSpec((TR, LANES), in_map)],
        out_specs=pl.BlockSpec((1, 8, LANES), lambda c, i: (c, 0, 0)),
        scratch_shapes=[pltpu.VMEM((8, LANES), jnp.float32)],
        compiler_params=pltpu.CompilerParams(
            dimension_semantics=("parallel", "arbitrary"),
            vmem_limit_bytes=_VMEM_LIMIT),
    )(x2, y2)
    # Tiny cross-core combine (2*8*128 f32) outside the kernel.
    return jnp.sum(partials).reshape(1, 1).astype(out_dtype)


# ---------------------------------------------------------------------------
# Module equivalent
# ---------------------------------------------------------------------------
class Similarity:
    """JAX/Pallas port of the PyTorch Similarity module (no learned parameters)."""

    def __init__(self, temp, sim='cos'):
        self.temp = float(temp)
        self.sim = sim

    def __call__(self, x, y):
        out_dtype = jnp.result_type(x.dtype, y.dtype)
        if self.sim == 'cos':
            return self._cos(x, y, out_dtype)
        # torch.dot(flatten(x), flatten(y)).unsqueeze(0).unsqueeze(0) -> (1,1)
        return _call_dot(x.reshape(-1), y.reshape(-1), out_dtype)

    def _cos(self, x, y, out_dtype):
        xl, yl = x.shape[:-1], y.shape[:-1]
        nd = max(len(xl), len(yl))
        xl = (1,) * (nd - len(xl)) + tuple(xl)
        yl = (1,) * (nd - len(yl)) + tuple(yl)
        out_lead = tuple(max(a, b) for a, b in zip(xl, yl))

        x_axes = [i for i, (a, b) in enumerate(zip(xl, yl)) if a > 1 and b == 1]
        y_axes = [i for i, (a, b) in enumerate(zip(xl, yl)) if b > 1 and a == 1]
        shared = [i for i, (a, b) in enumerate(zip(xl, yl)) if a > 1 and b > 1]

        # Pairwise broadcast (x varies on leading axes, y on trailing leading axes, no
        # shared >1 batch axes) -> tiled matmul kernel; avoids an (M*N, H) intermediate.
        pairwise = (
            x.shape[-1] == y.shape[-1]
            and not shared
            and bool(x_axes or y_axes)
            and (not x_axes or not y_axes or max(x_axes) < min(y_axes))
        )
        if pairwise:
            H = x.shape[-1]
            out = _call_cos_pairwise(x.reshape(-1, H), y.reshape(-1, H),
                                     self.temp, out_dtype)
            return out.reshape(out_lead)

        # Same-shape / shared-batch / interleaved broadcast: row-wise cosine.
        # TODO(synk): shared >1 batch axes could use a batched-matmul kernel instead of
        # materializing the broadcast; rare in this module's usage, so kept simple.
        bshape = jnp.broadcast_shapes(x.shape, y.shape)
        H = bshape[-1]
        xb = jnp.broadcast_to(x, bshape).reshape(-1, H)
        yb = jnp.broadcast_to(y, bshape).reshape(-1, H)
        out = _call_cos_rowwise(xb, yb, self.temp, out_dtype)
        return out.reshape(bshape[:-1])


# ---------------------------------------------------------------------------
# Pure-JAX references for verification
# ---------------------------------------------------------------------------
def _ref_cos(x, y, temp):
    dot = jnp.sum(x * y, axis=-1)
    xn = jnp.maximum(jnp.linalg.norm(x, axis=-1), _EPS)
    yn = jnp.maximum(jnp.linalg.norm(y, axis=-1), _EPS)
    return dot / (xn * yn) / temp


def _ref_dot(x, y):
    return jnp.dot(x.reshape(-1), y.reshape(-1)).reshape(1, 1)


if __name__ == "__main__":
    key = jax.random.PRNGKey(0)
    kx, ky, kx2, ky2, kx3, ky3, kx4, ky4 = jax.random.split(key, 8)
    temp = 0.05
    sim_cos = Similarity(temp, sim='cos')

    # 1) SimCSE-style broadcast (fused single-K pairwise kernel): (B,1,H) x (1,B,H) -> (B,B)
    B, H = 2, 32
    x = jax.random.normal(kx, (B, 1, H), dtype=jnp.float32)
    y = jax.random.normal(ky, (1, B, H), dtype=jnp.float32)
    out_pair = jax.block_until_ready(sim_cos(x, y))
    ref_pair = _ref_cos(x, y, temp)
    assert out_pair.shape == ref_pair.shape == (B, B)
    assert jnp.allclose(out_pair, ref_pair, rtol=1e-4, atol=1e-4)

    # 2) Same-shape (row-wise) inputs: (B,H) -> (B,)
    x2 = jax.random.normal(kx2, (B, H), dtype=jnp.float32)
    y2 = jax.random.normal(ky2, (B, H), dtype=jnp.float32)
    out_row = jax.block_until_ready(sim_cos(x2, y2))
    ref_row = _ref_cos(x2, y2, temp)
    assert out_row.shape == ref_row.shape == (B,)
    assert jnp.allclose(out_row, ref_row, rtol=1e-4, atol=1e-4)

    # 3) Large-H pairwise path (K-tiled accumulator + hoisted inv-norms), small M/N.
    M3, N3, H3 = 4, 6, 2304
    x3 = jax.random.normal(kx3, (M3, 1, H3), dtype=jnp.float32)
    y3 = jax.random.normal(ky3, (1, N3, H3), dtype=jnp.float32)
    out3 = jax.block_until_ready(sim_cos(x3, y3))
    ref3 = _ref_cos(x3, y3, temp)
    assert out3.shape == ref3.shape == (M3, N3)
    assert jnp.allclose(out3, ref3, rtol=1e-4, atol=1e-4)

    # 4) The non-'cos' branch: flat dot product -> (1,1)
    sim_dot = Similarity(temp, sim='dot')
    out_dot = jax.block_until_ready(sim_dot(x, y))
    ref_dot = _ref_dot(x, y)
    assert out_dot.shape == (1, 1)
    assert jnp.allclose(out_dot, ref_dot, rtol=1e-4, atol=1e-3)

    # 5) Structural test of the multi-block / dual-core dot path (tiny tiles, ragged edge).
    L = 3000
    xf = jax.random.normal(kx4, (L,), dtype=jnp.float32)
    yf = jax.random.normal(ky4, (L,), dtype=jnp.float32)
    out_d2 = jax.block_until_ready(_call_dot(xf, yf, jnp.float32, max_rows=8))
    ref_d2 = jnp.dot(xf, yf).reshape(1, 1)
    assert out_d2.shape == (1, 1)
    assert jnp.allclose(out_d2, ref_d2, rtol=1e-4, atol=1e-2)

    print("KERNEL_OK")
</pallas_src>

<mosaic_0001>
module attributes {stable_mosaic.version = 11 : i64} {
  func.func @_cos_pairwise_fused_kernel(%arg0: i32, %arg1: i32, %arg2: memref<2x32xf32, #tpu.memory_space<vmem>>, %arg3: memref<2x32xf32, #tpu.memory_space<vmem>>, %arg4: memref<2x2xf32, #tpu.memory_space<vmem>>) attributes {dimension_semantics = [#tpu.dimension_semantics<parallel>, #tpu.dimension_semantics<parallel>], iteration_bounds = array<i64: 1, 1>, scalar_prefetch = 0 : i64, scratch_operands = 0 : i64, tpu.core_type = #tpu.core_type<tc>, window_params = [{transform_indices = @transform_0, window_bounds = array<i64: 2, 32>}, {transform_indices = @transform_1, window_bounds = array<i64: 2, 32>}, {transform_indices = @transform_2, window_bounds = array<i64: 2, 2>}]} {
    %c0 = arith.constant 0 : index
    %c0_0 = arith.constant 0 : index
    %0 = vector.load %arg2[%c0, %c0_0] : memref<2x32xf32, #tpu.memory_space<vmem>>, vector<2x32xf32>
    %c0_1 = arith.constant 0 : index
    %c0_2 = arith.constant 0 : index
    %1 = vector.load %arg3[%c0_1, %c0_2] : memref<2x32xf32, #tpu.memory_space<vmem>>, vector<2x32xf32>
    %2 = arith.mulf %1, %1 : vector<2x32xf32>
    %cst = arith.constant dense<0.000000e+00> : vector<2xf32>
    %3 = vector.multi_reduction <add>, %2, %cst [1] : vector<2x32xf32> to vector<2xf32>
    %4 = vector.shape_cast %3 : vector<2xf32> to vector<2x1xf32>
    %cst_3 = arith.constant 1.000000e-16 : f32
    %5 = vector.broadcast %cst_3 : f32 to vector<2x1xf32>
    %6 = arith.maximumf %4, %5 : vector<2x1xf32>
    %7 = math.rsqrt %6 : vector<2x1xf32>
    %8 = vector.broadcast %7 : vector<2x1xf32> to vector<2x32xf32>
    %9 = arith.mulf %1, %8 : vector<2x32xf32>
    %cst_4 = arith.constant dense<0.000000e+00> : vector<2x2xf32>
    %10 = tpu.matmul %0, %9, %cst_4 {dimension_numbers = #tpu.dot_dimension_numbers<[1], [1], [0], [0], [0, 0, 1, 0], [], []>} : vector<2x32xf32>, vector<2x32xf32>, vector<2x2xf32> -> vector<2x2xf32>
    %11 = arith.mulf %0, %0 : vector<2x32xf32>
    %cst_5 = arith.constant dense<0.000000e+00> : vector<2xf32>
    %12 = vector.multi_reduction <add>, %11, %cst_5 [1] : vector<2x32xf32> to vector<2xf32>
    %13 = vector.shape_cast %12 : vector<2xf32> to vector<2x1xf32>
    %cst_6 = arith.constant 1.000000e-16 : f32
    %14 = vector.broadcast %cst_6 : f32 to vector<2x1xf32>
    %15 = arith.maximumf %13, %14 : vector<2x1xf32>
    %16 = math.rsqrt %15 : vector<2x1xf32>
    %cst_7 = arith.constant 2.000000e+01 : f32
    %17 = vector.broadcast %cst_7 : f32 to vector<2x1xf32>
    %18 = arith.mulf %16, %17 : vector<2x1xf32>
    %19 = vector.broadcast %18 : vector<2x1xf32> to vector<2x2xf32>
    %20 = arith.mulf %10, %19 : vector<2x2xf32>
    %c0_8 = arith.constant 0 : index
    %c0_9 = arith.constant 0 : index
    %21 = vector.load %arg4[%c0_8, %c0_9] : memref<2x2xf32, #tpu.memory_space<vmem>>, vector<2x2xf32>
    tpu.vector_store %arg4[%c0_8, %c0_9], %20 {strides = array<i32>} : memref<2x2xf32, #tpu.memory_space<vmem>>, vector<2x2xf32>,
    return
  }
  func.func @transform_0(%arg0: i32, %arg1: i32) -> (i32, i32) {
    %c0_i32 = arith.constant 0 : i32
    %c0_i32_0 = arith.constant 0 : i32
    return %arg0, %c0_i32 : i32, i32
  }
  func.func @transform_1(%arg0: i32, %arg1: i32) -> (i32, i32) {
    %c0_i32 = arith.constant 0 : i32
    %c0_i32_0 = arith.constant 0 : i32
    return %arg1, %c0_i32 : i32, i32
  }
  func.func @transform_2(%arg0: i32, %arg1: i32) -> (i32, i32) {
    %c0_i32 = arith.constant 0 : i32
    return %arg0, %arg1 : i32, i32
  }
}

</mosaic_0001>

<bundles_post_ra>
// kernel: tpu_custom_call.1
= control target key start
LH: loop header
LB: loop body
LE: loop exit
PB: predicated region body
PF: predicated region fallthrough
CT: control target
= control target key end

     0   :  { %7 = vsyncpa [#allocation3], 0  ;;  %s247_s0 = inlined_call_operand.hbm [shape: f32[2,32], index: 0, kind: input, shape index: {}]   ;;  %s248_s1 = inlined_call_operand.vmem [shape: f32[2,32], index: 1, kind: input, shape index: {}]   ;;  %s249_s2 = inlined_call_operand.hbm [shape: f32[2,2], index: 2, kind: output, shape index: {}]  }
   0x1   :  { %8 = vsyncpa [#allocation4], 0  ;;  %s201_s9 = smov [#allocation2]   ;;  %s153_s13 = scalar_lea.hbm %s247_s0, 32 }
   0x2   :  { %s15_s10 = sshll.u32 %s201_s9, 4  ;;  %p154_p0 = scmp.ne.s32.totalorder %s247_s0, %s153_s13  ;;  %s16_s10 = int_to_ptr.vmem [resolvable:$true] %s15_s10 }
   0x3   :  { %p157_p1 = scmp.lt.u32.totalorder %s153_s13, %s247_s0 }
   0x5   :  { %p159_p2 = pnand %p157_p1, %p154_p0 }
   0x7   :  { %162 = shalt.err (!%p159_p2)
}
   0x8   :  { %s163_s18 = scalar_lea.vmem %s16_s10, 32  ;;  %p168_p4 = scmp.lt.s32.totalorder %s16_s10, %s16_s10 }
   0x9   :  { %p164_p3 = scmp.ne.s32.totalorder %s16_s10, %s163_s18  ;;  %p169_p5 = scmp.lt.s32.totalorder %s163_s18, %s163_s18 }
   0xb   :  { %p170_p6 = por %p169_p5, %p168_p4 }
   0xd   :  { %p171_p7 = pnand %p170_p6, %p164_p3 }
   0xf   :  { %174 = shalt.err (!%p171_p7)
}
  0x10   :  { %18 = dma.hbm_to_vmem [thread:$0]  %s247_s0, 32, %s16_s10, [#allocation3]  }
  0x11   :  { %197 = dma.done.wait [#allocation3], 32  }
  0x12   :  { %198 = vsyncadd [#allocation3], 4294967264  ;;  %v25_v0 = vld [vmem:[%s248_s1] sm:$0x3]  ;;  %vm27_vm0 = vcmask 254976   ;;  %v202_v3 = vmov 0.0  }
  0x13   :  { %v26_v1 = vmul.f32 %v25_v0, %v25_v0  ;;  %140 = vmatprep.subr.mxu0 %v202_v3  ;;  %vm203_vm1 = vmmov 0   ;;  %v24_v4 = vld [vmem:[#allocation2] sm:$0x3]  ;;  %vm34_vm2 = vcmask 261120   ;;  %s204_s0 = smov [#allocation5]   ;;  %vm119_vm3 = vcmask 9216  }
  0x14   :  { %142 = vmatprep.mubr.msk.f32.mxu0 %vm203_vm1, %v202_v3  ;;  %v111_v5 = vmul.f32 %v24_v4, %v24_v4  ;;  %s127_s1 = sshll.u32 %s204_s0, 4  ;;  %s128_s1 = int_to_ptr.vmem [resolvable:$true] %s127_s1 }
  0x15   :  { %v28_v2 = vsel %vm27_vm0, %v26_v1, 0.0  ;;  %s175_s23 = scalar_lea.vmem %s128_s1, 32  ;;  %p180_p9 = scmp.lt.s32.totalorder %s128_s1, %s128_s1 }
  0x16   :  { %29 = vadd.xlane.f32.xlu0 %v28_v2  ;;  %v112_v6 = vsel %vm27_vm0, %v111_v5, 0.0  ;;  %p176_p8 = scmp.ne.s32.totalorder %s128_s1, %s175_s23  ;;  %p181_p10 = scmp.lt.s32.totalorder %s175_s23, %s175_s23 }
  0x18   :  { %p182_p11 = por %p181_p10, %p180_p9 }
  0x1a   :  { %113 = vadd.xlane.f32.xlu0 %v112_v6  ;;  %p183_p12 = pnand %p182_p11, %p176_p8 }
  0xa3   :  { %v30_v7 = vpop.xlane.xlu0 %29 }
  0xa4   :  { %v31_v8 = vmax.f32 %v30_v7, 1e-16 }
  0xa6   :  { %149 = vrsqrt.f32 %v31_v8 }
  0xa7   :  { %v114_v11 = vpop.xlane.xlu0 %113 }
  0xa8   :  { %v115_v12 = vmax.f32 %v114_v11, 1e-16 }
  0xaa   :  { %151 = vrsqrt.f32 %v115_v12 }
  0xb0   :  { %v150_v9 = vpop.eup %149 }
  0xb1   :  { %v33_v10 = vmul.f32 %v150_v9, %v25_v0 }
  0xb3   :  { %141 = vmatpush3.xpose.msk.msra.mxu0 %vm34_vm2, %v33_v10 }
  0xb4   :  { %v152_v13 = vpop.eup %151 }
  0xb5   :  { %v117_v14 = vmul.f32 20.0, %v152_v13 }
  0xb6   :  { %143 = vmatmul.mubr.msk.f32.vlgmr.msra.gmra.mrb[0].mxu0 %vm34_vm2, %v24_v4 }
 0x189   :  { %v107_v15 = vpop.f32.mrb[0].mxu0 }
 0x18a   :  { %v118_v16 = vmul.f32 %v117_v14, %v107_v15  ;;  %v144_v17 = vpop.f32.mrb[1].mxu0 }
 0x18c   :  { %120 = vst.msk [vmem:[#allocation5] sm:$0x3] %vm119_vm3, %v118_v16 }
 0x18d   :  { %186 = shalt.err (!%p183_p12)
}
 0x18e   :  { %s187_s26 = scalar_lea.hbm %s249_s2, 32 }
 0x18f   :  { %p188_p13 = scmp.ne.s32.totalorder %s249_s2, %s187_s26  ;;  %p191_p0 = scmp.lt.u32.totalorder %s187_s26, %s249_s2 }
 0x191   :  { %p193_p1 = pnand %p191_p0, %p188_p13 }
 0x193   :  { %196 = shalt.err (!%p193_p1)
}
 0x194   :  { %130 = dma.vmem_to_hbm [thread:$0]  %s128_s1, 32, %s249_s2, [#allocation4]  }
 0x195   :  { %199 = dma.done.wait [#allocation4], 32  }
 0x196   :  { %200 = vsyncadd [#allocation4], 4294967264 }
 0x197   :  { %134 = vsyncpa [#allocation3], 1 }
 0x198   :  { %135 = vsyncpa [#allocation4], 1 }

</bundles_post_ra>
